<compile_context>
chip_gen: v6e
topology: v6e:2x2x1
jax: 0.10.0
libtpu: 0.0.40
codegen_flags: <defaults>
</compile_context>

<pallas_src>
import math
import numpy as np
import jax
import jax.numpy as jnp
from jax.experimental import pallas as pl
from jax.experimental.pallas import tpu as pltpu

# ----------------------------- configuration -------------------------------
B = 4                    # batch size (human-object pairs)
RES_FEAT = 128           # flattened ResNet feature dim   (orig 2048)
P_DIM = 60               # preprocess_dim                 (orig 1000)
IN_DIM = 2 * P_DIM + 8   # 128 = 4 + P + P + 4            (orig 2008)
HID_DIM = 64             # GCN hidden dim                 (orig 512)
OUT_DIM = 64             # GCN output dim                 (orig 512)
NUM_CLASSES = 26         # action classes
NUM_NODES = 2            # max_num_nodes

LANES = 128              # lane width of every packed block
SUBLANES = 8             # f32 sublane count (pair-axis padding granularity)
W_ROWS = 768             # total rows of the packed bf16 weight slab

# Block row offsets inside the weight slab (all multiples of 16 so bf16
# sublane-packed slices never cross a tile boundary).
OFF_WH = 0      # (128) hfeat -> node lanes 4:64
OFF_WO = 128    # (128) ofeat -> node lanes 64:124
OFF_G1 = 256    # (128) GCN layer 1
OFF_G2 = 384    # ( 64) 2*Wg2  (2x folded in)
OFF_C1 = 448    # ( 64) Wc1[:64] + Wc1[64:]  (edge = [o, o])
OFF_C2 = 512    # (128) Wc2
OFF_C3 = 640    # ( 64) Wc3
OFF_C4 = 704    # ( 64) Wc4 -> lanes 0:26 (lane-dense padded output)

# Adjacency exactly as built in LIGHTEN_image.__init__ (all-ones for N=2).
A_np = np.zeros((NUM_NODES, NUM_NODES), dtype=np.float32)
A_np[0, :] = 1.0
A_np[:, 0] = 1.0
for _i in range(NUM_NODES):
    A_np[_i, _i] = 1.0


# ------------------------------- the kernel --------------------------------
def lighten_kernel(hf_ref, of_ref, box_ref, w_ref, wbox_ref, b_ref, out_ref):
    f32 = jnp.float32
    bf16 = jnp.bfloat16

    def mm(a, lo, rows):
        # bf16 x bf16 MXU matmul, f32 accumulation.
        return jnp.dot(a.astype(bf16), w_ref[lo:lo + rows, :],
                       preferred_element_type=f32)

    def bv(i):
        return b_ref[i:i + 1, :]            # f32 bias row, broadcast over M

    # Fused node assembly.  The block-structured weights land hfeat@Wh in
    # lanes 4:64, ofeat@Wo in 64:124, and the scaled boxes in 0:4 / 124:128,
    # i.e. node = node0 + node1 of the 2-node graph — all that is needed
    # downstream because the adjacency is all-ones.
    node = (mm(hf_ref[...], OFF_WH, 128)
            + mm(of_ref[...], OFF_WO, 128)
            + jnp.dot(box_ref[...], wbox_ref[...], preferred_element_type=f32)
            + bv(0))                                            # (m, 128)

    # GCN layer 1: g0 == g1 == node0+node1 -> single node path.
    h = jnp.maximum(mm(node, OFF_G1, 128) + bv(1), 0.0)         # lanes 64: = 0
    # GCN layer 2: g == h0 + h1 == 2h; the 2x is folded into the weight block.
    o = jnp.maximum(mm(h[:, :64], OFF_G2, 64) + bv(2), 0.0)     # lanes 64: = 0

    # Edge classifier.  Layer-1 weight is the host-side fold Wc1[:D]+Wc1[D:]
    # because edge_feats = concat(o0, o1) with o0 == o1.
    z = jnp.maximum(mm(o[:, :64], OFF_C1, 64) + bv(3), 0.0)     # (m, 128)
    z = jnp.maximum(mm(z, OFF_C2, 128) + bv(4), 0.0)            # lanes 64: = 0
    z = jnp.maximum(mm(z[:, :64], OFF_C3, 64) + bv(5), 0.0)     # lanes 64: = 0
    out_ref[...] = mm(z[:, :64], OFF_C4, 64) + bv(6)            # lanes 26: = 0


# ------------------------ one-time parameter packing ------------------------
def pack_params(p):
    # The node-collapse fusion (h0==h1, o0==o1), the 2x fold into Wg2, and the
    # Wc1 fold are only valid for the fixed all-ones 2-node adjacency that
    # LIGHTEN_image builds.
    assert NUM_NODES == 2 and np.all(A_np == 1.0)

    scale = np.array([1.0 / 640, 1.0 / 480, 1.0 / 640, 1.0 / 480], np.float32)

    def block(rows, w, col_off=0):
        out = np.zeros((rows, LANES), np.float32)
        w = np.asarray(w, np.float32)
        out[:w.shape[0], col_off:col_off + w.shape[1]] = w
        return out

    Wc1 = np.asarray(p["Wc1"], np.float32)
    Wc1_fold = Wc1[:OUT_DIM] + Wc1[OUT_DIM:]          # edge = [o, o], o0 == o1

    w_slab = np.concatenate([
        block(128, p["Wh"], col_off=4),                         # OFF_WH
        block(128, p["Wo"], col_off=4 + P_DIM),                 # OFF_WO
        block(128, p["Wg1"]),                                   # OFF_G1
        block(64, 2.0 * np.asarray(p["Wg2"], np.float32)),      # OFF_G2 (2x)
        block(64, Wc1_fold),                                    # OFF_C1
        block(128, p["Wc2"]),                                   # OFF_C2
        block(64, p["Wc3"]),                                    # OFF_C3
        block(64, p["Wc4"]),                                    # OFF_C4
    ], axis=0)
    assert w_slab.shape == (W_ROWS, LANES)

    # Box scatter+scale block kept as its own tiny f32 input (8,128).
    w_box = np.zeros((SUBLANES, LANES), np.float32)
    for j in range(4):
        w_box[j, j] = scale[j]                        # hbox -> lanes 0:4
        w_box[4 + j, IN_DIM - 4 + j] = scale[j]       # obox -> lanes 124:128

    def pad_bias(b):
        out = np.zeros((1, LANES), np.float32)
        b = np.asarray(b, np.float32).reshape(1, -1)
        out[:, :b.shape[1]] = b
        return out

    b0 = np.zeros((1, LANES), np.float32)             # bh / bo in node lanes
    b0[:, 4:4 + P_DIM] = np.asarray(p["bh"]).reshape(1, -1)
    b0[:, 4 + P_DIM:4 + 2 * P_DIM] = np.asarray(p["bo"]).reshape(1, -1)

    b_slab = np.concatenate([
        b0,
        pad_bias(p["bg1"]), pad_bias(p["bg2"]), pad_bias(p["bc1"]),
        pad_bias(p["bc2"]), pad_bias(p["bc3"]), pad_bias(p["bc4"]),
        np.zeros((1, LANES), np.float32),
    ], axis=0)                                        # (8, 128) f32

    return (jnp.asarray(w_slab, jnp.bfloat16),        # weights in bf16
            jnp.asarray(w_box, jnp.float32),
            jnp.asarray(b_slab, jnp.float32))         # biases stay f32


# --------------------------- hot-path wrapper --------------------------------
@jax.jit
def lighten_pairs(hfeat, ofeat, boxes, w_slab, w_box, b_slab):
    """Pads/concats must happen before this call.  Inputs:
       hfeat (Bp,128) f32, ofeat (Bp,128) f32, boxes (Bp,8) f32, Bp % 8 == 0.
       Returns lane-dense, zero-padded scores (Bp, 128) f32."""
    bp = hfeat.shape[0]
    m_tile = math.gcd(bp, LANES)          # >= 8; == 128 for large padded batches
    grid = (bp // m_tile,)

    row128 = pl.BlockSpec((m_tile, LANES), lambda i: (i, 0))
    return pl.pallas_call(
        lighten_kernel,
        out_shape=jax.ShapeDtypeStruct((bp, LANES), jnp.float32),
        grid=grid,
        in_specs=[
            row128,                                             # hfeat
            row128,                                             # ofeat
            pl.BlockSpec((m_tile, 8), lambda i: (i, 0)),        # boxes
            pl.BlockSpec((W_ROWS, LANES), lambda i: (0, 0)),    # weights (resident)
            pl.BlockSpec((SUBLANES, LANES), lambda i: (0, 0)),  # box scatter block
            pl.BlockSpec((SUBLANES, LANES), lambda i: (0, 0)),  # biases (resident)
        ],
        out_specs=row128,
        compiler_params=pltpu.CompilerParams(
            dimension_semantics=("parallel",)),   # v7x: shard M tiles over 2 TCs
    )(hfeat, ofeat, boxes, w_slab, w_box, b_slab)


def prepare_pair_inputs(hbox, obox, hfeat4d, ofeat4d):
    """Host-side (off the hot path): flatten feats, fuse the two box vectors,
    zero-pad the pair axis to a sublane multiple for unmasked stores."""
    hbox = np.asarray(hbox, np.float32)
    obox = np.asarray(obox, np.float32)
    b = hbox.shape[0]
    bp = ((b + SUBLANES - 1) // SUBLANES) * SUBLANES
    hf = np.zeros((bp, RES_FEAT), np.float32)
    of = np.zeros((bp, RES_FEAT), np.float32)
    bx = np.zeros((bp, 8), np.float32)
    hf[:b] = np.asarray(hfeat4d, np.float32).reshape(b, -1)
    of[:b] = np.asarray(ofeat4d, np.float32).reshape(b, -1)
    bx[:b, :4] = hbox
    bx[:b, 4:] = obox
    return jnp.asarray(hf), jnp.asarray(of), jnp.asarray(bx)


# --------------------------- pure-JAX reference ------------------------------
def reference_forward(hbox, obox, hfeat4d, ofeat4d, p):
    bsz = hbox.shape[0]
    hfeat = hfeat4d.reshape(bsz, -1)
    ofeat = ofeat4d.reshape(bsz, -1)
    h_pre = hfeat @ p["Wh"] + p["bh"]
    o_pre = ofeat @ p["Wo"] + p["bo"]
    scale = jnp.array([1.0 / 640, 1.0 / 480, 1.0 / 640, 1.0 / 480], jnp.float32)
    hb = hbox * scale
    ob = obox * scale

    node = jnp.zeros((bsz, NUM_NODES, IN_DIM), jnp.float32)
    node = node.at[:, 0, :4].set(hb)
    node = node.at[:, 0, 4:4 + P_DIM].set(h_pre)
    node = node.at[:, 1, 4 + P_DIM:IN_DIM - 4].set(o_pre)
    node = node.at[:, 1, IN_DIM - 4:].set(ob)

    A = jnp.asarray(A_np)
    # graph conv layer 1:  (x @ A) then 1x1 conv (per-node linear) + relu
    g = jnp.einsum("vw,bvc->bwc", A, node)
    h = jax.nn.relu(jnp.einsum("bwc,cd->bwd", g, p["Wg1"]) + p["bg1"])
    # graph conv layer 2
    g = jnp.einsum("vw,bvc->bwc", A, h)
    o = jax.nn.relu(jnp.einsum("bwc,cd->bwd", g, p["Wg2"]) + p["bg2"])

    e = o.reshape(bsz, 2 * OUT_DIM)          # edge_feats
    z = jax.nn.relu(e @ p["Wc1"] + p["bc1"])
    z = jax.nn.relu(z @ p["Wc2"] + p["bc2"])
    z = jax.nn.relu(z @ p["Wc3"] + p["bc3"])
    return z @ p["Wc4"] + p["bc4"]


# --------------------------------- main --------------------------------------
def make_params(key):
    def init(k, shape, s=0.05):
        return (s * jax.random.normal(k, shape)).astype(jnp.float32)

    ks = jax.random.split(key, 20)
    return {
        "Wh": init(ks[0], (RES_FEAT, P_DIM)),   "bh": init(ks[1], (1, P_DIM)),
        "Wo": init(ks[2], (RES_FEAT, P_DIM)),   "bo": init(ks[3], (1, P_DIM)),
        "Wg1": init(ks[4], (IN_DIM, HID_DIM)),  "bg1": init(ks[5], (1, HID_DIM)),
        "Wg2": init(ks[6], (HID_DIM, OUT_DIM)), "bg2": init(ks[7], (1, OUT_DIM)),
        "Wc1": init(ks[8], (2 * OUT_DIM, 2 * OUT_DIM)), "bc1": init(ks[9], (1, 2 * OUT_DIM)),
        "Wc2": init(ks[10], (2 * OUT_DIM, OUT_DIM)),    "bc2": init(ks[11], (1, OUT_DIM)),
        "Wc3": init(ks[12], (OUT_DIM, OUT_DIM)),        "bc3": init(ks[13], (1, OUT_DIM)),
        "Wc4": init(ks[14], (OUT_DIM, NUM_CLASSES)),    "bc4": init(ks[15], (1, NUM_CLASSES)),
    }


if __name__ == "__main__":
    key = jax.random.PRNGKey(0)
    kp, kb1, kb2, kf1, kf2 = jax.random.split(key, 5)
    params = make_params(kp)

    # one-time parameter preprocessing (packing, folding, trimming, bf16 cast)
    w_slab, w_box, b_slab = pack_params(params)

    box_scale = jnp.array([640.0, 480.0, 640.0, 480.0], jnp.float32)
    batch_human_boxes = jax.random.uniform(kb1, (B, 4)) * box_scale
    batch_object_boxes = jax.random.uniform(kb2, (B, 4)) * box_scale
    batch_res_human_feats = jax.random.normal(kf1, (B, RES_FEAT, 1, 1), jnp.float32)
    batch_res_object_feats = jax.random.normal(kf2, (B, RES_FEAT, 1, 1), jnp.float32)

    # Host-side input prep (off the hot path), then one fused kernel call.
    hfeat, ofeat, boxes = prepare_pair_inputs(
        batch_human_boxes, batch_object_boxes,
        batch_res_human_feats, batch_res_object_feats)
    out_padded = lighten_pairs(hfeat, ofeat, boxes, w_slab, w_box, b_slab)
    out_padded = jax.block_until_ready(out_padded)

    # Narrow slice only for the correctness check; production consumers can
    # keep the zero-padded lane-dense (Bp, 128) result.
    scores = np.asarray(out_padded)[:B, :NUM_CLASSES]

    ref = reference_forward(
        batch_human_boxes, batch_object_boxes,
        batch_res_human_feats, batch_res_object_feats, params)
    ref = np.asarray(jax.block_until_ready(ref))

    assert scores.shape == (B, NUM_CLASSES)
    # Tolerance covers bf16 weight/LHS rounding vs. the f32 reference.
    assert np.allclose(scores, ref, atol=1e-2, rtol=1e-2), "kernel/reference mismatch"
    print("KERNEL_OK")
</pallas_src>

<mosaic_0001>
module attributes {stable_mosaic.version = 11 : i64} {
  func.func @lighten_kernel(%arg0: i32, %arg1: memref<8x128xf32, #tpu.memory_space<vmem>>, %arg2: memref<8x128xf32, #tpu.memory_space<vmem>>, %arg3: memref<8x8xf32, #tpu.memory_space<vmem>>, %arg4: memref<768x128xbf16, #tpu.memory_space<vmem>>, %arg5: memref<8x128xf32, #tpu.memory_space<vmem>>, %arg6: memref<8x128xf32, #tpu.memory_space<vmem>>, %arg7: memref<8x128xf32, #tpu.memory_space<vmem>>) attributes {dimension_semantics = [#tpu.dimension_semantics<parallel>], iteration_bounds = array<i64: 1>, scalar_prefetch = 0 : i64, scratch_operands = 0 : i64, tpu.core_type = #tpu.core_type<tc>, window_params = [{transform_indices = @transform_0, window_bounds = array<i64: 8, 128>}, {transform_indices = @transform_1, window_bounds = array<i64: 8, 128>}, {transform_indices = @transform_2, window_bounds = array<i64: 8, 8>}, {pipeline_mode = #tpu.pipeline_mode<synchronous>, transform_indices = @transform_3, window_bounds = array<i64: 768, 128>}, {pipeline_mode = #tpu.pipeline_mode<synchronous>, transform_indices = @transform_4, window_bounds = array<i64: 8, 128>}, {pipeline_mode = #tpu.pipeline_mode<synchronous>, transform_indices = @transform_5, window_bounds = array<i64: 8, 128>}, {transform_indices = @transform_6, window_bounds = array<i64: 8, 128>}]} {
    %c0 = arith.constant 0 : index
    %c0_0 = arith.constant 0 : index
    %0 = vector.load %arg1[%c0, %c0_0] : memref<8x128xf32, #tpu.memory_space<vmem>>, vector<8x128xf32>
    %1 = arith.truncf %0 : vector<8x128xf32> to vector<8x128xbf16>
    %c0_1 = arith.constant 0 : index
    %c0_2 = arith.constant 0 : index
    %2 = vector.load %arg4[%c0_1, %c0_2] : memref<768x128xbf16, #tpu.memory_space<vmem>>, vector<128x128xbf16>
    %cst = arith.constant dense<0.000000e+00> : vector<8x128xf32>
    %3 = tpu.matmul %1, %2, %cst {dimension_numbers = #tpu.dot_dimension_numbers<[1], [0], [0], [1], [0, 0, 1, 1], [], []>} : vector<8x128xbf16>, vector<128x128xbf16>, vector<8x128xf32> -> vector<8x128xf32>
    %c0_3 = arith.constant 0 : index
    %c0_4 = arith.constant 0 : index
    %4 = vector.load %arg2[%c0_3, %c0_4] : memref<8x128xf32, #tpu.memory_space<vmem>>, vector<8x128xf32>
    %5 = arith.truncf %4 : vector<8x128xf32> to vector<8x128xbf16>
    %c128 = arith.constant 128 : index
    %c0_5 = arith.constant 0 : index
    %6 = vector.load %arg4[%c128, %c0_5] : memref<768x128xbf16, #tpu.memory_space<vmem>>, vector<128x128xbf16>
    %cst_6 = arith.constant dense<0.000000e+00> : vector<8x128xf32>
    %7 = tpu.matmul %5, %6, %cst_6 {dimension_numbers = #tpu.dot_dimension_numbers<[1], [0], [0], [1], [0, 0, 1, 1], [], []>} : vector<8x128xbf16>, vector<128x128xbf16>, vector<8x128xf32> -> vector<8x128xf32>
    %8 = arith.addf %3, %7 : vector<8x128xf32>
    %c0_7 = arith.constant 0 : index
    %c0_8 = arith.constant 0 : index
    %9 = vector.load %arg3[%c0_7, %c0_8] : memref<8x8xf32, #tpu.memory_space<vmem>>, vector<8x8xf32>
    %c0_9 = arith.constant 0 : index
    %c0_10 = arith.constant 0 : index
    %10 = vector.load %arg5[%c0_9, %c0_10] : memref<8x128xf32, #tpu.memory_space<vmem>>, vector<8x128xf32>
    %cst_11 = arith.constant dense<0.000000e+00> : vector<8x128xf32>
    %11 = tpu.matmul %9, %10, %cst_11 {dimension_numbers = #tpu.dot_dimension_numbers<[1], [0], [0], [1], [0, 0, 1, 1], [], []>} : vector<8x8xf32>, vector<8x128xf32>, vector<8x128xf32> -> vector<8x128xf32>
    %12 = arith.addf %8, %11 : vector<8x128xf32>
    %c0_12 = arith.constant 0 : index
    %c0_13 = arith.constant 0 : index
    %13 = vector.load %arg6[%c0_12, %c0_13] : memref<8x128xf32, #tpu.memory_space<vmem>>, vector<1x128xf32>
    %14 = vector.broadcast %13 : vector<1x128xf32> to vector<8x128xf32>
    %15 = arith.addf %12, %14 : vector<8x128xf32>
    %16 = arith.truncf %15 : vector<8x128xf32> to vector<8x128xbf16>
    %c256 = arith.constant 256 : index
    %c0_14 = arith.constant 0 : index
    %17 = vector.load %arg4[%c256, %c0_14] : memref<768x128xbf16, #tpu.memory_space<vmem>>, vector<128x128xbf16>
    %cst_15 = arith.constant dense<0.000000e+00> : vector<8x128xf32>
    %18 = tpu.matmul %16, %17, %cst_15 {dimension_numbers = #tpu.dot_dimension_numbers<[1], [0], [0], [1], [0, 0, 1, 1], [], []>} : vector<8x128xbf16>, vector<128x128xbf16>, vector<8x128xf32> -> vector<8x128xf32>
    %c1 = arith.constant 1 : index
    %c0_16 = arith.constant 0 : index
    %19 = vector.load %arg6[%c1, %c0_16] : memref<8x128xf32, #tpu.memory_space<vmem>>, vector<1x128xf32>
    %20 = vector.broadcast %19 : vector<1x128xf32> to vector<8x128xf32>
    %21 = arith.addf %18, %20 : vector<8x128xf32>
    %cst_17 = arith.constant 0.000000e+00 : f32
    %22 = vector.broadcast %cst_17 : f32 to vector<8x128xf32>
    %23 = arith.maximumf %21, %22 : vector<8x128xf32>
    %24 = vector.extract_strided_slice %23 {offsets = [0, 0], sizes = [8, 64], strides = [1, 1]} : vector<8x128xf32> to vector<8x64xf32>
    %25 = arith.truncf %24 : vector<8x64xf32> to vector<8x64xbf16>
    %c384 = arith.constant 384 : index
    %c0_18 = arith.constant 0 : index
    %26 = vector.load %arg4[%c384, %c0_18] : memref<768x128xbf16, #tpu.memory_space<vmem>>, vector<64x128xbf16>
    %cst_19 = arith.constant dense<0.000000e+00> : vector<8x128xf32>
    %27 = tpu.matmul %25, %26, %cst_19 {dimension_numbers = #tpu.dot_dimension_numbers<[1], [0], [0], [1], [0, 0, 1, 1], [], []>} : vector<8x64xbf16>, vector<64x128xbf16>, vector<8x128xf32> -> vector<8x128xf32>
    %c2 = arith.constant 2 : index
    %c0_20 = arith.constant 0 : index
    %28 = vector.load %arg6[%c2, %c0_20] : memref<8x128xf32, #tpu.memory_space<vmem>>, vector<1x128xf32>
    %29 = vector.broadcast %28 : vector<1x128xf32> to vector<8x128xf32>
    %30 = arith.addf %27, %29 : vector<8x128xf32>
    %cst_21 = arith.constant 0.000000e+00 : f32
    %31 = vector.broadcast %cst_21 : f32 to vector<8x128xf32>
    %32 = arith.maximumf %30, %31 : vector<8x128xf32>
    %33 = vector.extract_strided_slice %32 {offsets = [0, 0], sizes = [8, 64], strides = [1, 1]} : vector<8x128xf32> to vector<8x64xf32>
    %34 = arith.truncf %33 : vector<8x64xf32> to vector<8x64xbf16>
    %c448 = arith.constant 448 : index
    %c0_22 = arith.constant 0 : index
    %35 = vector.load %arg4[%c448, %c0_22] : memref<768x128xbf16, #tpu.memory_space<vmem>>, vector<64x128xbf16>
    %cst_23 = arith.constant dense<0.000000e+00> : vector<8x128xf32>
    %36 = tpu.matmul %34, %35, %cst_23 {dimension_numbers = #tpu.dot_dimension_numbers<[1], [0], [0], [1], [0, 0, 1, 1], [], []>} : vector<8x64xbf16>, vector<64x128xbf16>, vector<8x128xf32> -> vector<8x128xf32>
    %c3 = arith.constant 3 : index
    %c0_24 = arith.constant 0 : index
    %37 = vector.load %arg6[%c3, %c0_24] : memref<8x128xf32, #tpu.memory_space<vmem>>, vector<1x128xf32>
    %38 = vector.broadcast %37 : vector<1x128xf32> to vector<8x128xf32>
    %39 = arith.addf %36, %38 : vector<8x128xf32>
    %cst_25 = arith.constant 0.000000e+00 : f32
    %40 = vector.broadcast %cst_25 : f32 to vector<8x128xf32>
    %41 = arith.maximumf %39, %40 : vector<8x128xf32>
    %42 = arith.truncf %41 : vector<8x128xf32> to vector<8x128xbf16>
    %c512 = arith.constant 512 : index
    %c0_26 = arith.constant 0 : index
    %43 = vector.load %arg4[%c512, %c0_26] : memref<768x128xbf16, #tpu.memory_space<vmem>>, vector<128x128xbf16>
    %cst_27 = arith.constant dense<0.000000e+00> : vector<8x128xf32>
    %44 = tpu.matmul %42, %43, %cst_27 {dimension_numbers = #tpu.dot_dimension_numbers<[1], [0], [0], [1], [0, 0, 1, 1], [], []>} : vector<8x128xbf16>, vector<128x128xbf16>, vector<8x128xf32> -> vector<8x128xf32>
    %c4 = arith.constant 4 : index
    %c0_28 = arith.constant 0 : index
    %45 = vector.load %arg6[%c4, %c0_28] : memref<8x128xf32, #tpu.memory_space<vmem>>, vector<1x128xf32>
    %46 = vector.broadcast %45 : vector<1x128xf32> to vector<8x128xf32>
    %47 = arith.addf %44, %46 : vector<8x128xf32>
    %cst_29 = arith.constant 0.000000e+00 : f32
    %48 = vector.broadcast %cst_29 : f32 to vector<8x128xf32>
    %49 = arith.maximumf %47, %48 : vector<8x128xf32>
    %50 = vector.extract_strided_slice %49 {offsets = [0, 0], sizes = [8, 64], strides = [1, 1]} : vector<8x128xf32> to vector<8x64xf32>
    %51 = arith.truncf %50 : vector<8x64xf32> to vector<8x64xbf16>
    %c640 = arith.constant 640 : index
    %c0_30 = arith.constant 0 : index
    %52 = vector.load %arg4[%c640, %c0_30] : memref<768x128xbf16, #tpu.memory_space<vmem>>, vector<64x128xbf16>
    %cst_31 = arith.constant dense<0.000000e+00> : vector<8x128xf32>
    %53 = tpu.matmul %51, %52, %cst_31 {dimension_numbers = #tpu.dot_dimension_numbers<[1], [0], [0], [1], [0, 0, 1, 1], [], []>} : vector<8x64xbf16>, vector<64x128xbf16>, vector<8x128xf32> -> vector<8x128xf32>
    %c5 = arith.constant 5 : index
    %c0_32 = arith.constant 0 : index
    %54 = vector.load %arg6[%c5, %c0_32] : memref<8x128xf32, #tpu.memory_space<vmem>>, vector<1x128xf32>
    %55 = vector.broadcast %54 : vector<1x128xf32> to vector<8x128xf32>
    %56 = arith.addf %53, %55 : vector<8x128xf32>
    %cst_33 = arith.constant 0.000000e+00 : f32
    %57 = vector.broadcast %cst_33 : f32 to vector<8x128xf32>
    %58 = arith.maximumf %56, %57 : vector<8x128xf32>
    %59 = vector.extract_strided_slice %58 {offsets = [0, 0], sizes = [8, 64], strides = [1, 1]} : vector<8x128xf32> to vector<8x64xf32>
    %60 = arith.truncf %59 : vector<8x64xf32> to vector<8x64xbf16>
    %c704 = arith.constant 704 : index
    %c0_34 = arith.constant 0 : index
    %61 = vector.load %arg4[%c704, %c0_34] : memref<768x128xbf16, #tpu.memory_space<vmem>>, vector<64x128xbf16>
    %cst_35 = arith.constant dense<0.000000e+00> : vector<8x128xf32>
    %62 = tpu.matmul %60, %61, %cst_35 {dimension_numbers = #tpu.dot_dimension_numbers<[1], [0], [0], [1], [0, 0, 1, 1], [], []>} : vector<8x64xbf16>, vector<64x128xbf16>, vector<8x128xf32> -> vector<8x128xf32>
    %c6 = arith.constant 6 : index
    %c0_36 = arith.constant 0 : index
    %63 = vector.load %arg6[%c6, %c0_36] : memref<8x128xf32, #tpu.memory_space<vmem>>, vector<1x128xf32>
    %64 = vector.broadcast %63 : vector<1x128xf32> to vector<8x128xf32>
    %65 = arith.addf %62, %64 : vector<8x128xf32>
    %c0_37 = arith.constant 0 : index
    %c0_38 = arith.constant 0 : index
    %66 = vector.load %arg7[%c0_37, %c0_38] : memref<8x128xf32, #tpu.memory_space<vmem>>, vector<8x128xf32>
    tpu.vector_store %arg7[%c0_37, %c0_38], %65 {strides = array<i32>} : memref<8x128xf32, #tpu.memory_space<vmem>>, vector<8x128xf32>,
    return
  }
  func.func @transform_0(%arg0: i32) -> (i32, i32) {
    %c0_i32 = arith.constant 0 : i32
    %c0_i32_0 = arith.constant 0 : i32
    return %arg0, %c0_i32 : i32, i32
  }
  func.func @transform_1(%arg0: i32) -> (i32, i32) {
    %c0_i32 = arith.constant 0 : i32
    %c0_i32_0 = arith.constant 0 : i32
    return %arg0, %c0_i32 : i32, i32
  }
  func.func @transform_2(%arg0: i32) -> (i32, i32) {
    %c0_i32 = arith.constant 0 : i32
    %c0_i32_0 = arith.constant 0 : i32
    return %arg0, %c0_i32 : i32, i32
  }
  func.func @transform_3(%arg0: i32) -> (i32, i32) {
    %c0_i32 = arith.constant 0 : i32
    %c0_i32_0 = arith.constant 0 : i32
    %c0_i32_1 = arith.constant 0 : i32
    return %c0_i32, %c0_i32_0 : i32, i32
  }
  func.func @transform_4(%arg0: i32) -> (i32, i32) {
    %c0_i32 = arith.constant 0 : i32
    %c0_i32_0 = arith.constant 0 : i32
    %c0_i32_1 = arith.constant 0 : i32
    return %c0_i32, %c0_i32_0 : i32, i32
  }
  func.func @transform_5(%arg0: i32) -> (i32, i32) {
    %c0_i32 = arith.constant 0 : i32
    %c0_i32_0 = arith.constant 0 : i32
    %c0_i32_1 = arith.constant 0 : i32
    return %c0_i32, %c0_i32_0 : i32, i32
  }
  func.func @transform_6(%arg0: i32) -> (i32, i32) {
    %c0_i32 = arith.constant 0 : i32
    %c0_i32_0 = arith.constant 0 : i32
    return %arg0, %c0_i32 : i32, i32
  }
}

</mosaic_0001>

<bundles_post_ra>
// kernel: lighten_pairs.1
= control target key start
LH: loop header
LB: loop body
LE: loop exit
PB: predicated region body
PF: predicated region fallthrough
CT: control target
= control target key end

     0   :  { %11 = vsyncpa [#allocation3], 0  ;;  %s1541_s0 = inlined_call_operand.hbm [shape: f32[8,128], index: 0, kind: input, shape index: {}]   ;;  %s1542_s1 = inlined_call_operand.hbm [shape: f32[8,128], index: 1, kind: input, shape index: {}]   ;;  %s1543_s2 = inlined_call_operand.hbm [shape: f32[8,8], index: 2, kind: input, shape index: {}]   ;;  %s1544_s3 = inlined_call_operand.hbm [shape: bf16[768,128], index: 3, kind: input, shape index: {}]   ;;  %s1545_s4 = inlined_call_operand.hbm [shape: f32[8,128], index: 4, kind: input, shape index: {}]   ;;  %s1546_s5 = inlined_call_operand.vmem [shape: f32[8,128], index: 5, kind: input, shape index: {}]   ;;  %s1547_s6 = inlined_call_operand.hbm [shape: f32[8,128], index: 6, kind: output, shape index: {}]  }
   0x1   :  { %12 = vsyncpa [#allocation6], 0 }
   0x2   :  { %13 = vsyncpa [#allocation9], 0 }
   0x3   :  { %14 = vsyncpa [#allocation4], 0  ;;  %s1385_s21 = smov [#allocation5]   ;;  %s1386_s23 = smov [#allocation8]  }
   0x4   :  { %s31_s22 = sshll.u32 %s1385_s21, 4  ;;  %s50_s24 = sshll.u32 %s1386_s23, 4  ;;  %s32_s22 = int_to_ptr.vmem [resolvable:$true] %s31_s22  ;;  %s51_s24 = int_to_ptr.vmem [resolvable:$true] %s50_s24 }
   0x5   :  { %s1265_s25 = scalar_lea.vmem %s32_s22, 128  ;;  %p1270_p1 = scmp.lt.s32.totalorder %s32_s22, %s32_s22 }
   0x6   :  { %p1266_p0 = scmp.ne.s32.totalorder %s32_s22, %s1265_s25  ;;  %p1271_p2 = scmp.lt.s32.totalorder %s1265_s25, %s1265_s25 }
   0x8   :  { %p1272_p3 = por %p1271_p2, %p1270_p1 }
   0xa   :  { %p1273_p4 = pnand %p1272_p3, %p1266_p0 }
   0xc   :  { %1276 = shalt.err (!%p1273_p4)
}
   0xd   :  { %34 = dma.hbm_to_vmem [thread:$0]  %s1542_s1, 128, %s32_s22, [#allocation6]  }
   0xe   :  { %s1285_s28 = scalar_lea.vmem %s51_s24, 6144  ;;  %p1290_p6 = scmp.lt.s32.totalorder %s51_s24, %s51_s24 }
   0xf   :  { %p1286_p5 = scmp.ne.s32.totalorder %s51_s24, %s1285_s28  ;;  %p1291_p7 = scmp.lt.s32.totalorder %s1285_s28, %s1285_s28 }
  0x11   :  { %p1292_p8 = por %p1291_p7, %p1290_p6 }
  0x13   :  { %p1293_p9 = pnand %p1292_p8, %p1286_p5 }
  0x15   :  { %1296 = shalt.err (!%p1293_p9)
}
  0x16   :  { %s1387_s29 = smov 64   ;;  %s1388_s30 = smov 4  }
  0x17   :  { %56 = dma.hbm_to_vmem [thread:$0]  %s1544_s3, 6144, %s51_s24, [#allocation9], %s1387_s29, %s1387_s29, %s1388_s30  }
  0x18   :  { %s1389_s9 = smov [#allocation2]   ;;  %s1390_s11 = smov [#allocation7]  }
  0x19   :  { %s21_s10 = sshll.u32 %s1389_s9, 4  ;;  %s41_s12 = sshll.u32 %s1390_s11, 4  ;;  %s22_s10 = int_to_ptr.vmem [resolvable:$true] %s21_s10  ;;  %s42_s12 = int_to_ptr.vmem [resolvable:$true] %s41_s12 }
  0x1a   :  { %s1305_s1 = scalar_lea.vmem %s22_s10, 128  ;;  %p1310_p11 = scmp.lt.s32.totalorder %s22_s10, %s22_s10 }
  0x1b   :  { %p1306_p10 = scmp.ne.s32.totalorder %s22_s10, %s1305_s1  ;;  %p1311_p12 = scmp.lt.s32.totalorder %s1305_s1, %s1305_s1 }
  0x1d   :  { %p1312_p13 = por %p1311_p12, %p1310_p11 }
  0x1f   :  { %p1313_p0 = pnand %p1312_p13, %p1306_p10 }
  0x21   :  { %1316 = shalt.err (!%p1313_p0)
}
  0x22   :  { %24 = dma.hbm_to_vmem [thread:$0]  %s1541_s0, 128, %s22_s10, [#allocation3]  }
  0x23   :  { %s1325_s15 = scalar_lea.vmem %s42_s12, 128  ;;  %p1330_p2 = scmp.lt.s32.totalorder %s42_s12, %s42_s12 }
  0x24   :  { %p1326_p1 = scmp.ne.s32.totalorder %s42_s12, %s1325_s15  ;;  %p1331_p3 = scmp.lt.s32.totalorder %s1325_s15, %s1325_s15 }
  0x26   :  { %p1332_p4 = por %p1331_p3, %p1330_p2 }
  0x28   :  { %p1333_p5 = pnand %p1332_p4, %p1326_p1 }
  0x2a   :  { %1336 = shalt.err (!%p1333_p5)
}
  0x2b   :  { %44 = dma.hbm_to_vmem [thread:$0]  %s1543_s2, 128, %s42_s12, [#allocation6]  }
  0x2c   :  { %s1391_s17 = smov [#allocation10]  }
  0x2d   :  { %s63_s18 = sshll.u32 %s1391_s17, 4  ;;  %s64_s18 = int_to_ptr.vmem [resolvable:$true] %s63_s18 }
  0x2e   :  { %s1345_s19 = scalar_lea.vmem %s64_s18, 128  ;;  %p1350_p7 = scmp.lt.s32.totalorder %s64_s18, %s64_s18 }
  0x2f   :  { %p1346_p6 = scmp.ne.s32.totalorder %s64_s18, %s1345_s19  ;;  %p1351_p8 = scmp.lt.s32.totalorder %s1345_s19, %s1345_s19 }
  0x31   :  { %p1352_p9 = por %p1351_p8, %p1350_p7 }
  0x33   :  { %p1353_p10 = pnand %p1352_p9, %p1346_p6 }
  0x35   :  { %1356 = shalt.err (!%p1353_p10)
}
  0x36   :  { %66 = dma.hbm_to_vmem [thread:$0]  %s1545_s4, 128, %s64_s18, [#allocation9]  }
  0x37   :  { %1377 = dma.done.wait [#allocation3], 128  }
  0x38   :  { %1378 = vsyncadd [#allocation3], 4294967168 }
  0x39   :  { %1379 = dma.done.wait [#allocation6], 256  }
  0x3a   :  { %1380 = vsyncadd [#allocation6], 4294967040 }
  0x3b   :  { %1381 = dma.done.wait [#allocation9], 6272  }
  0x3c   :  { %1382 = vsyncadd [#allocation9], 4294961024  ;;  %v1392_v0 = vmov 0.0   ;;  %vm1393_vm0 = vmmov 0   ;;  %v1209_v1 = vld [vmem:[#allocation8 + $0x78] sm:$0xff]   ;;  %v1211_v3 = vld [vmem:[#allocation8 + $0x70] sm:$0xff]  }
  0x3d   :  { %1066 = vmatprep.subr.bf16.mxu0 %v1392_v0  ;;  %1086 = vmatprep.subr.bf16.mxu1 %v1392_v0  ;;  %v1210_v2 = vld [vmem:[#allocation8 + $0x38] sm:$0xff]   ;;  %v1212_v4 = vld [vmem:[#allocation8 + $0x30] sm:$0xff]   ;;  %v1213_v5 = vld [vmem:[#allocation8 + $0x68] sm:$0xff]   ;;  %vm299_vm1 = vcmask 64512   ;;  %vm529_vm2 = vcmask 523264   ;;  %s1394_s9 = smov [#allocation11]  }
  0x3e   :  { %1082 = vmatprep.mubr.msk.bf16.mxu0 %vm1393_vm0, %v1392_v0  ;;  %1102 = vmatprep.mubr.msk.bf16.mxu1 %vm1393_vm0, %v1392_v0  ;;  %v1214_v6 = vld [vmem:[#allocation8 + $0x28] sm:$0xff]   ;;  %v1215_v7 = vld [vmem:[#allocation8 + $0x60] sm:$0xff]   ;;  %v1217_v9 = vld [vmem:[#allocation8 + $0x58] sm:$0xff]   ;;  %s937_s10 = sshll.u32 %s1394_s9, 4  ;;  %s938_s10 = int_to_ptr.vmem [resolvable:$true] %s937_s10 }
  0x3f   :  { %1067 = vmatpush3.bf16.msra.mxu0 %v1209_v1  ;;  %1087 = vmatpush3.bf16.msra.mxu1 %v1210_v2  ;;  %v1216_v8 = vld [vmem:[#allocation8 + $0x20] sm:$0xff]   ;;  %v1218_v10 = vld [vmem:[#allocation8 + $0x18] sm:$0xff]   ;;  %v1219_v11 = vld [vmem:[#allocation8 + $0x50] sm:$0xff]   ;;  %s1357_s11 = scalar_lea.vmem %s938_s10, 128  ;;  %p1362_p12 = scmp.lt.s32.totalorder %s938_s10, %s938_s10 }
  0x40   :  { %1068 = vmatprep.subr.bf16.mxu0 %v1392_v0  ;;  %1088 = vmatprep.subr.bf16.mxu1 %v1392_v0  ;;  %v1220_v12 = vld [vmem:[#allocation8 + $0x10] sm:$0xff]   ;;  %v1221_v13 = vld [vmem:[#allocation8 + $0x48] sm:$0xff]   ;;  %v1223_v15 = vld [vmem:[#allocation8 + $0x40] sm:$0xff]   ;;  %p1358_p11 = scmp.ne.s32.totalorder %s938_s10, %s1357_s11  ;;  %p1363_p13 = scmp.lt.s32.totalorder %s1357_s11, %s1357_s11 }
  0x41   :  { %v1222_v14 = vld [vmem:[#allocation8 + $0x8] sm:$0xff]   ;;  %v103_v16 = vld [vmem:[#allocation5] sm:$0xff]  ;;  %v1224_v17 = vld [vmem:[#allocation8] sm:$0xff]  }
  0x42   :  { %v85_v18 = vld [vmem:[#allocation2] sm:$0xff]  ;;  %v104_v19 = vpack.c.bf16 %v103_v16, %v103_v16  ;;  %v298_v20 = vld [vmem:[#allocation10] sm:$0xff]  ;;  %v1225_v21 = vld [vmem:[#allocation8 + $0xb8] sm:$0xff]   ;;  %p1364_p0 = por %p1363_p13, %p1362_p12 }
  0x43   :  { %1069 = vmatpush3.bf16.msra.mxu0 %v1211_v3  ;;  %1089 = vmatpush3.bf16.msra.mxu1 %v1212_v4  ;;  %v86_v22 = vpack.c.bf16 %v85_v18, %v85_v18  ;;  %v1226_v23 = vld [vmem:[#allocation8 + $0xb0] sm:$0xff]   ;;  %v297_v24 = vld [vmem:[#allocation7] sm:$0xff]  ;;  %v1227_v25 = vld [vmem:[#allocation8 + $0xa8] sm:$0xff]  }
  0x44   :  { %1070 = vmatprep.subr.bf16.mxu0 %v1392_v0  ;;  %1090 = vmatprep.subr.bf16.mxu1 %v1392_v0  ;;  %v1228_v26 = vld [vmem:[#allocation8 + $0xa0] sm:$0xff]   ;;  %v1229_v27 = vld [vmem:[#allocation8 + $0x98] sm:$0xff]   ;;  %v1230_v28 = vld [vmem:[#allocation8 + $0x90] sm:$0xff]   ;;  %p1365_p1 = pnand %p1364_p0, %p1358_p11 }
  0x45   :  { %v1231_v29 = vld [vmem:[#allocation8 + $0x88] sm:$0xff]   ;;  %v1232_v30 = vld [vmem:[#allocation8 + $0x80] sm:$0xff]   ;;  %v1233_v31 = vld [vmem:[#allocation8 + $0xd8] sm:$0xff]  }
  0x46   :  { %v1234_v32 = vld [vmem:[#allocation8 + $0xd0] sm:$0xff]   ;;  %v965_v43 = vld [vmem:[%s1546_s5] ss:$0 sm:$0xff]  ;;  %v1236_v49 = vld [vmem:[#allocation8 + $0xc0] sm:$0xff]  }
  0x47   :  { %1071 = vmatpush3.bf16.msra.mxu0 %v1213_v5  ;;  %1091 = vmatpush3.bf16.msra.mxu1 %v1214_v6  ;;  %v1235_v48 = vld [vmem:[#allocation8 + $0xc8] sm:$0xff]   ;;  %v1237_v56 = vld [vmem:[#allocation8 + $0xf8] sm:$0xff]   ;;  %v1238_v59 = vld [vmem:[#allocation8 + $0xf0] sm:$0xff]  }
  0x48   :  { %1072 = vmatprep.subr.bf16.mxu0 %v1392_v0  ;;  %1092 = vmatprep.subr.bf16.mxu1 %v1392_v0  ;;  %v966_v50 = vld [vmem:[%s1546_s5 + $0x1] ss:$0 sm:$0xff]  ;;  %v1240_v61 = vld [vmem:[#allocation8 + $0xe0] sm:$0xff]   ;;  %v1241_v62 = vld [vmem:[#allocation8 + $0x138] sm:$0xff]  }
  0x49   :  { %v1239_v60 = vld [vmem:[#allocation8 + $0xe8] sm:$0xff]   ;;  %v1242_v63 = vld [vmem:[#allocation8 + $0x130] sm:$0xff]   ;;  %v1244_v2 = vld [vmem:[#allocation8 + $0x120] sm:$0xff]  }
  0x4a   :  { %v1243_v1 = vld [vmem:[#allocation8 + $0x128] sm:$0xff]   ;;  %v1245_v3 = vld [vmem:[#allocation8 + $0x118] sm:$0xff]   ;;  %v1246_v4 = vld [vmem:[#allocation8 + $0x110] sm:$0xff]  }
  0x4b   :  { %1073 = vmatpush3.bf16.msra.mxu0 %v1215_v7  ;;  %1093 = vmatpush3.bf16.msra.mxu1 %v1216_v8  ;;  %v975_v5 = vld [vmem:[%s1546_s5 + $0x2] ss:$0 sm:$0xff]  ;;  %v1250_v16 = vld [vmem:[#allocation8 + $0x150] sm:$0xff]  }
  0x4c   :  { %1074 = vmatprep.subr.bf16.mxu0 %v1392_v0  ;;  %1094 = vmatprep.subr.bf16.mxu1 %v1392_v0 }
  0x4f   :  { %1075 = vmatpush3.bf16.msra.mxu0 %v1217_v9  ;;  %1095 = vmatpush3.bf16.msra.mxu1 %v1218_v10 }
  0x50   :  { %1076 = vmatprep.subr.bf16.mxu0 %v1392_v0  ;;  %1096 = vmatprep.subr.bf16.mxu1 %v1392_v0 }
  0x53   :  { %1077 = vmatpush3.bf16.msra.mxu0 %v1219_v11  ;;  %1097 = vmatpush3.bf16.msra.mxu1 %v1220_v12 }
  0x54   :  { %1078 = vmatprep.subr.bf16.mxu0 %v1392_v0  ;;  %1098 = vmatprep.subr.bf16.mxu1 %v1392_v0 }
  0x57   :  { %1079 = vmatpush3.bf16.msra.mxu0 %v1221_v13  ;;  %1099 = vmatpush3.bf16.msra.mxu1 %v1222_v14  ;;  %v1247_v13 = vld [vmem:[#allocation8 + $0x108] sm:$0xff]   ;;  %v1248_v14 = vld [vmem:[#allocation8 + $0x100] sm:$0xff]  }
  0x58   :  { %1080 = vmatprep.subr.bf16.mxu0 %v1392_v0  ;;  %1100 = vmatprep.subr.bf16.mxu1 %v1392_v0 }
  0x5b   :  { %1081 = vmatpush3.bf16.msra.mxu0 %v1223_v15  ;;  %1101 = vmatpush3.bf16.msra.mxu1 %v1224_v17  ;;  %v1249_v15 = vld [vmem:[#allocation8 + $0x158] sm:$0xff]   ;;  %v981_v17 = vld [vmem:[%s1546_s5 + $0x3] ss:$0 sm:$0xff] }
  0x5c   :  { %1106 = vmatprep.subr.mxu0 %v1392_v0  ;;  %1111 = vmatprep.subr.bf16.mxu1 %v1392_v0 }
  0x5e   :  { %1083 = vmatmul.mubr.bf16.vlgmr.msra.gmra.mxu0 %v104_v19  ;;  %1103 = vmatmul.mubr.bf16.vlgmr.msra.gmra.mxu1 %v86_v22 }
  0x5f   :  { %1107 = vmatpush3.msra.mxu0 %v298_v20  ;;  %1108 = vmatprep.mubr.msk.f32.mxu0 %vm1393_vm0, %v1392_v0 }
  0x60   :  { %1112 = vmatpush3.bf16.msra.mxu1 %v1225_v21  ;;  %1127 = vmatprep.mubr.msk.bf16.mxu1 %vm1393_vm0, %v1392_v0 }
  0x61   :  { %1113 = vmatprep.subr.bf16.mxu1 %v1392_v0  ;;  %1131 = vmatprep.subr.bf16.mxu0 %v1392_v0 }
  0x64   :  { %1114 = vmatpush3.bf16.msra.mxu1 %v1226_v23 }
  0x65   :  { %1115 = vmatprep.subr.bf16.mxu1 %v1392_v0 }
  0x66   :  { %1109 = vmatmul.mubr.msk.f32.vlgmr.msra.gmra.mxu0 %vm299_vm1, %v297_v24 }
  0x67   :  { %1139 = vmatprep.mubr.msk.bf16.mxu0 %vm1393_vm0, %v1392_v0  ;;  %1132 = vmatpush3.bf16.msra.mxu0 %v1233_v31 }
  0x68   :  { %1116 = vmatpush3.bf16.msra.mxu1 %v1227_v25  ;;  %1133 = vmatprep.subr.bf16.mxu0 %v1392_v0  ;;  %v1251_v25 = vld [vmem:[#allocation8 + $0x148] sm:$0xff]  }
  0x69   :  { %1117 = vmatprep.subr.bf16.mxu1 %v1392_v0 }
  0x6b   :  { %1134 = vmatpush3.bf16.msra.mxu0 %v1234_v32 }
  0x6c   :  { %1118 = vmatpush3.bf16.msra.mxu1 %v1228_v26  ;;  %1135 = vmatprep.subr.bf16.mxu0 %v1392_v0  ;;  %v1252_v26 = vld [vmem:[#allocation8 + $0x140] sm:$0xff]  }
  0x6d   :  { %1119 = vmatprep.subr.bf16.mxu1 %v1392_v0 }
  0x6f   :  { %1136 = vmatpush3.bf16.msra.mxu0 %v1235_v48 }
  0x70   :  { %1120 = vmatpush3.bf16.msra.mxu1 %v1229_v27  ;;  %1137 = vmatprep.subr.bf16.mxu0 %v1392_v0  ;;  %v987_v27 = vld [vmem:[%s1546_s5 + $0x4] ss:$0 sm:$0xff] }
  0x71   :  { %1121 = vmatprep.subr.bf16.mxu1 %v1392_v0 }
  0x73   :  { %1138 = vmatpush3.bf16.msra.mxu0 %v1236_v49 }
  0x74   :  { %1122 = vmatpush3.bf16.msra.mxu1 %v1230_v28  ;;  %1143 = vmatprep.subr.bf16.mxu0 %v1392_v0 }
  0x75   :  { %1123 = vmatprep.subr.bf16.mxu1 %v1392_v0 }
  0x78   :  { %1124 = vmatpush3.bf16.msra.mxu1 %v1231_v29 }
  0x79   :  { %1125 = vmatprep.subr.bf16.mxu1 %v1392_v0 }
  0x7c   :  { %1126 = vmatpush3.bf16.msra.mxu1 %v1232_v30 }
  0x7d   :  { %1155 = vmatprep.subr.bf16.mxu1 %v1392_v0 }
 0x11e   :  { %v203_v33 = vpop.f32.mrf.mxu0  ;;  %v291_v34 = vpop.f32.mrf.mxu1 }
 0x11f   :  { %v292_v40 = vadd.f32 %v291_v34, %v203_v33  ;;  %v1253_v33 = vld [vmem:[#allocation8 + $0x178] sm:$0xff]  }
 0x120   :  { %v1084_v35 = vpop.f32.mrf.mxu0  ;;  %v1104_v36 = vpop.f32.mrf.mxu1 }
 0x121   :  { %v1254_v36 = vld [vmem:[#allocation8 + $0x170] sm:$0xff]  }
 0x122   :  { %v206_v37 = vpop.f32.mrf.mxu0  ;;  %v294_v38 = vpop.f32.mrf.mxu1 }
 0x123   :  { %v1255_v37 = vld [vmem:[#allocation8 + $0x168] sm:$0xff]   ;;  %v1256_v38 = vld [vmem:[#allocation8 + $0x160] sm:$0xff]  }
 0x124   :  { %v1085_v39 = vpop.f32.mrf.mxu0  ;;  %v1105_v41 = vpop.f32.mrf.mxu1 }
 0x125   :  { %v996_v39 = vld [vmem:[%s1546_s5 + $0x5] ss:$0 sm:$0xff] }
 0x126   :  { %v369_v42 = vpop.f32.mrf.mxu0 }
 0x127   :  { %v373_v44 = vadd.f32 %v369_v42, %v292_v40 }
 0x128   :  { %v1110_v45 = vpop.f32.mrf.mxu0 }
 0x129   :  { %v379_v46 = vadd.f32 %v965_v43, %v373_v44 }
 0x12b   :  { %v380_v47 = vpack.c.bf16 %v379_v46, %v379_v46 }
 0x12d   :  { %1128 = vmatmul.mubr.bf16.vlgmr.msra.gmra.mxu1 %v380_v47  ;;  %v1002_v47 = vld [vmem:[%s1546_s5 + $0x6] ss:$0 sm:$0xff] }
 0x12e   :  { %1171 = vmatprep.mubr.msk.bf16.mxu1 %vm1393_vm0, %v1392_v0  ;;  %1156 = vmatpush3.bf16.msra.mxu1 %v1241_v62 }
 0x12f   :  { %1157 = vmatprep.subr.bf16.mxu1 %v1392_v0 }
 0x132   :  { %1158 = vmatpush3.bf16.msra.mxu1 %v1242_v63 }
 0x133   :  { %1159 = vmatprep.subr.bf16.mxu1 %v1392_v0 }
 0x136   :  { %1160 = vmatpush3.bf16.msra.mxu1 %v1243_v1 }
 0x137   :  { %1161 = vmatprep.subr.bf16.mxu1 %v1392_v0 }
 0x13a   :  { %1162 = vmatpush3.bf16.msra.mxu1 %v1244_v2 }
 0x13b   :  { %1163 = vmatprep.subr.bf16.mxu1 %v1392_v0 }
 0x13e   :  { %1164 = vmatpush3.bf16.msra.mxu1 %v1245_v3 }
 0x13f   :  { %1165 = vmatprep.subr.bf16.mxu1 %v1392_v0 }
 0x142   :  { %1166 = vmatpush3.bf16.msra.mxu1 %v1246_v4 }
 0x143   :  { %1167 = vmatprep.subr.bf16.mxu1 %v1392_v0 }
 0x146   :  { %1168 = vmatpush3.bf16.msra.mxu1 %v1247_v13 }
 0x147   :  { %1169 = vmatprep.subr.bf16.mxu1 %v1392_v0 }
 0x14a   :  { %1170 = vmatpush3.bf16.msra.mxu1 %v1248_v14 }
 0x1ed   :  { %v484_v51 = vpop.f32.mrf.mxu1 }
 0x1ee   :  { %v485_v52 = vadd.f32 %v966_v50, %v484_v51 }
 0x1ef   :  { %v1129_v53 = vpop.f32.mrf.mxu1 }
 0x1f0   :  { %v490_v54 = vmax.f32 %v485_v52, 0.0 }
 0x1f1   :  { %v487_v55 = vpop.f32.mrf.mxu1 }
 0x1f2   :  { %v491_v57 = vpack.c.bf16 %v490_v54, %v490_v54 }
 0x1f3   :  { %v1130_v58 = vpop.f32.mrf.mxu1 }
 0x1f4   :  { %1140 = vmatmul.mubr.msk.bf16.vlgmr.msra.gmra.mxu0 %vm529_vm2, %v491_v57 }
 0x1f5   :  { %1144 = vmatpush3.bf16.msra.mxu0 %v1237_v56  ;;  %1151 = vmatprep.mubr.msk.bf16.mxu0 %vm1393_vm0, %v1392_v0 }
 0x1f6   :  { %1145 = vmatprep.subr.bf16.mxu0 %v1392_v0 }
 0x1f9   :  { %1146 = vmatpush3.bf16.msra.mxu0 %v1238_v59 }
 0x1fa   :  { %1147 = vmatprep.subr.bf16.mxu0 %v1392_v0 }
 0x1fd   :  { %1148 = vmatpush3.bf16.msra.mxu0 %v1239_v60 }
 0x1fe   :  { %1149 = vmatprep.subr.bf16.mxu0 %v1392_v0 }
 0x201   :  { %1150 = vmatpush3.bf16.msra.mxu0 %v1240_v61 }
 0x202   :  { %1175 = vmatprep.subr.bf16.mxu0 %v1392_v0 }
 0x2b4   :  { %v567_v6 = vpop.f32.mrf.mxu0 }
 0x2b5   :  { %v568_v7 = vadd.f32 %v975_v5, %v567_v6 }
 0x2b6   :  { %v1141_v8 = vpop.f32.mrf.mxu0 }
 0x2b7   :  { %v573_v9 = vmax.f32 %v568_v7, 0.0 }
 0x2b8   :  { %v570_v10 = vpop.f32.mrf.mxu0 }
 0x2b9   :  { %v574_v11 = vpack.c.bf16 %v573_v9, %v573_v9 }
 0x2ba   :  { %v1142_v12 = vpop.f32.mrf.mxu0 }
 0x2bb   :  { %1152 = vmatmul.mubr.msk.bf16.vlgmr.msra.gmra.mxu0 %vm529_vm2, %v574_v11 }
 0x2bc   :  { %1183 = vmatprep.mubr.msk.bf16.mxu0 %vm1393_vm0, %v1392_v0  ;;  %1176 = vmatpush3.bf16.msra.mxu0 %v1249_v15 }
 0x2bd   :  { %1177 = vmatprep.subr.bf16.mxu0 %v1392_v0 }
 0x2c0   :  { %1178 = vmatpush3.bf16.msra.mxu0 %v1250_v16 }
 0x2c1   :  { %1179 = vmatprep.subr.bf16.mxu0 %v1392_v0 }
 0x2c4   :  { %1180 = vmatpush3.bf16.msra.mxu0 %v1251_v25 }
 0x2c5   :  { %1181 = vmatprep.subr.bf16.mxu0 %v1392_v0 }
 0x2c8   :  { %1182 = vmatpush3.bf16.msra.mxu0 %v1252_v26 }
 0x2c9   :  { %1187 = vmatprep.subr.bf16.mxu0 %v1392_v0 }
 0x37b   :  { %v649_v18 = vpop.f32.mrf.mxu0 }
 0x37c   :  { %v650_v19 = vadd.f32 %v981_v17, %v649_v18 }
 0x37d   :  { %v1153_v20 = vpop.f32.mrf.mxu0 }
 0x37e   :  { %v655_v21 = vmax.f32 %v650_v19, 0.0 }
 0x37f   :  { %v652_v22 = vpop.f32.mrf.mxu0 }
 0x380   :  { %v656_v23 = vpack.c.bf16 %v655_v21, %v655_v21 }
 0x381   :  { %v1154_v24 = vpop.f32.mrf.mxu0 }
 0x382   :  { %1172 = vmatmul.mubr.bf16.vlgmr.msra.gmra.mxu1 %v656_v23 }
 0x442   :  { %v760_v28 = vpop.f32.mrf.mxu1 }
 0x443   :  { %v761_v29 = vadd.f32 %v987_v27, %v760_v28 }
 0x444   :  { %v1173_v30 = vpop.f32.mrf.mxu1 }
 0x445   :  { %v766_v31 = vmax.f32 %v761_v29, 0.0 }
 0x446   :  { %v763_v32 = vpop.f32.mrf.mxu1 }
 0x447   :  { %v767_v34 = vpack.c.bf16 %v766_v31, %v766_v31 }
 0x448   :  { %v1174_v35 = vpop.f32.mrf.mxu1 }
 0x449   :  { %1184 = vmatmul.mubr.msk.bf16.vlgmr.msra.gmra.mxu0 %vm529_vm2, %v767_v34 }
 0x44a   :  { %1188 = vmatpush3.bf16.msra.mxu0 %v1253_v33  ;;  %1195 = vmatprep.mubr.msk.bf16.mxu0 %vm1393_vm0, %v1392_v0 }
 0x44b   :  { %1189 = vmatprep.subr.bf16.mxu0 %v1392_v0 }
 0x44e   :  { %1190 = vmatpush3.bf16.msra.mxu0 %v1254_v36 }
 0x44f   :  { %1191 = vmatprep.subr.bf16.mxu0 %v1392_v0 }
 0x452   :  { %1192 = vmatpush3.bf16.msra.mxu0 %v1255_v37 }
 0x453   :  { %1193 = vmatprep.subr.bf16.mxu0 %v1392_v0 }
 0x456   :  { %1194 = vmatpush3.bf16.msra.mxu0 %v1256_v38 }
 0x509   :  { %v842_v40 = vpop.f32.mrf.mxu0 }
 0x50a   :  { %v843_v41 = vadd.f32 %v996_v39, %v842_v40 }
 0x50b   :  { %v1185_v42 = vpop.f32.mrf.mxu0 }
 0x50c   :  { %v848_v43 = vmax.f32 %v843_v41, 0.0 }
 0x50d   :  { %v845_v44 = vpop.f32.mrf.mxu0 }
 0x50e   :  { %v849_v45 = vpack.c.bf16 %v848_v43, %v848_v43 }
 0x50f   :  { %v1186_v46 = vpop.f32.mrf.mxu0 }
 0x510   :  { %1196 = vmatmul.mubr.msk.bf16.vlgmr.msra.gmra.mxu0 %vm529_vm2, %v849_v45 }
 0x5d0   :  { %v924_v0 = vpop.f32.mrf.mxu0 }
 0x5d1   :  { %v925_v48 = vadd.f32 %v1002_v47, %v924_v0 }
 0x5d2   :  { %v1197_v49 = vpop.f32.mrf.mxu0 }
 0x5d3   :  { %930 = vst [vmem:[#allocation11] sm:$0xff] %v925_v48 }
 0x5d4   :  { %v927_v50 = vpop.f32.mrf.mxu0 }
 0x5d5   :  { %1368 = shalt.err (!%p1365_p1)
}
 0x5d6   :  { %940 = dma.vmem_to_hbm [thread:$0]  %s938_s10, 128, %s1547_s6, [#allocation4]   ;;  %v1198_v51 = vpop.f32.mrf.mxu0 }
 0x5d7   :  { %1383 = dma.done.wait [#allocation4], 128  }
 0x5d8   :  { %1384 = vsyncadd [#allocation4], 4294967168 }
 0x5d9   :  { %944 = vsyncpa [#allocation3], 1 }
 0x5da   :  { %945 = vsyncpa [#allocation6], 1 }
 0x5db   :  { %946 = vsyncpa [#allocation9], 1 }
 0x5dc   :  { %947 = vsyncpa [#allocation4], 1 }

</bundles_post_ra>
